<compile_context>
chip_gen: v7x
topology: tpu7x:2x2x1
jax: 0.10.0
libtpu: 0.0.40
codegen_flags: <defaults>
</compile_context>

<pallas_src>
import jax
import jax.numpy as jnp
from jax.experimental import pallas as pl
from jax.experimental.pallas import tpu as pltpu


def add_conv1x1_kernel(a_ref, b_ref, w_ref, o_ref):
    # a_ref, b_ref: (C_in, HW) f32 activations (NCHW-native contiguous views)
    # w_ref:        (C_out_blk, C_in) weight tile (bf16 or f32)
    # o_ref:        (C_out_blk, HW) f32 output tile
    x = a_ref[...] + b_ref[...]                 # exact f32 add on the VPU
    x = x.astype(w_ref.dtype)                   # single cast for the MXU (no-op if f32)
    o_ref[...] = jnp.dot(
        w_ref[...], x, preferred_element_type=jnp.float32
    ).astype(o_ref.dtype)                       # 1x1 conv == matmul, f32 accumulate


def _tensorcores_per_chip() -> int:
    """Best-effort detection: v7x has 2 TensorCores/chip, v5e/v6e have 1."""
    try:
        kind = jax.devices()[0].device_kind.lower()
    except Exception:
        return 1
    return 2 if "v7" in kind else 1


def add_conv1x1(a2d, b2d, w2d, *, n_blocks=1, vmem_limit_bytes=4 << 20):
    """a2d, b2d: (C_in, HW) f32; w2d: (C_out, C_in) f32/bf16 -> (C_out, HW) f32."""
    C_in, HW = a2d.shape
    C_out = w2d.shape[0]
    if n_blocks < 1 or C_out % n_blocks != 0:
        n_blocks = 1
    blk_co = C_out // n_blocks

    flops = 2 * C_out * C_in * HW
    bytes_accessed = (
        a2d.size * a2d.dtype.itemsize
        + b2d.size * b2d.dtype.itemsize
        + w2d.size * w2d.dtype.itemsize
        + C_out * HW * 4
    )

    grid_spec = pltpu.PrefetchScalarGridSpec(
        num_scalar_prefetch=0,
        grid=(n_blocks,),
        in_specs=[
            # Activations: full block every step (re-used across the C_out split).
            pl.BlockSpec((C_in, HW), lambda i: (0, 0)),
            pl.BlockSpec((C_in, HW), lambda i: (0, 0)),
            # Weight / output: split along C_out so 2 TCs (v7x) can share the work.
            pl.BlockSpec((blk_co, C_in), lambda i: (i, 0)),
        ],
        out_specs=pl.BlockSpec((blk_co, HW), lambda i: (i, 0)),
    )

    return pl.pallas_call(
        add_conv1x1_kernel,
        out_shape=jax.ShapeDtypeStruct((C_out, HW), jnp.float32),
        grid_spec=grid_spec,
        cost_estimate=pl.CostEstimate(
            flops=flops, transcendentals=0, bytes_accessed=bytes_accessed
        ),
        compiler_params=pltpu.CompilerParams(
            dimension_semantics=("parallel",),
            vmem_limit_bytes=vmem_limit_bytes,
        ),
    )(a2d, b2d, w2d)


def forward(x106, x98, conv_weight, *, use_bf16_matmul=True):
    """Mirrors M.forward: out = Conv2d_1x1(x106 + x98), no bias.

    x106, x98:    (1, C_in, H, W)  NCHW float32
    conv_weight:  (C_out, C_in, 1, 1) float32 (PyTorch Conv2d weight layout)
    returns:      (1, C_out, H, W) NCHW float32
    """
    N, C_in, H, W = x106.shape
    C_out = conv_weight.shape[0]
    assert N == 1, "wrapper specialized to the module's batch size of 1"
    # TODO(synk): for N > 1 fold the batch into a grid axis over N.

    # With N == 1 these reshapes are pure bitcasts of contiguous NCHW data:
    # no transposes, no extra HBM round-trips outside the kernel.
    a2d = x106.reshape(C_in, H * W)                     # (80, 196)
    b2d = x98.reshape(C_in, H * W)                      # (80, 196)
    w2d = conv_weight.reshape(C_out, C_in)              # (480, 80)
    if use_bf16_matmul:
        # In a real model the weight would be stored in bf16 once, not cast per call.
        w2d = w2d.astype(jnp.bfloat16)

    n_blocks = _tensorcores_per_chip()                  # 2 on v7x, 1 on v5e/v6e
    out2d = add_conv1x1(a2d, b2d, w2d, n_blocks=n_blocks)  # (480, 196)
    return out2d.reshape(N, C_out, H, W)                # bitcast back to NCHW


if __name__ == "__main__":
    key = jax.random.PRNGKey(0)
    k1, k2, k3 = jax.random.split(key, 3)

    # Shapes from the module: x106, x98: [1, 80, 14, 14]; conv 80 -> 480, 1x1, no bias.
    N, C_in, H, W, C_out = 1, 80, 14, 14, 480
    x106 = jax.random.normal(k1, (N, C_in, H, W), dtype=jnp.float32)
    x98 = jax.random.normal(k2, (N, C_in, H, W), dtype=jnp.float32)
    conv_weight = jax.random.normal(k3, (C_out, C_in, 1, 1), dtype=jnp.float32) * 0.05

    fwd = jax.jit(forward)
    out = jax.block_until_ready(fwd(x106, x98, conv_weight))
    assert out.shape == (N, C_out, H, W)
    assert out.dtype == jnp.float32

    # Reference check in plain JAX (1x1 conv == einsum over channels), f32.
    ref = jnp.einsum(
        "nchw,oc->nohw", x106 + x98, conv_weight.reshape(C_out, C_in)
    )
    # bf16 MXU operands (per perf review) -> slightly looser tolerance vs f32 ref.
    assert jnp.allclose(out, ref, atol=3e-2, rtol=3e-2), (
        float(jnp.max(jnp.abs(out - ref)))
    )

    print("KERNEL_OK")
</pallas_src>

<mosaic_0001>
module attributes {stable_mosaic.version = 11 : i64} {
  func.func @add_conv1x1_kernel(%arg0: i32, %arg1: memref<80x196xf32, #tpu.memory_space<vmem>>, %arg2: memref<80x196xf32, #tpu.memory_space<vmem>>, %arg3: memref<480x80xbf16, #tpu.memory_space<vmem>>, %arg4: memref<480x196xf32, #tpu.memory_space<vmem>>) attributes {dimension_semantics = [#tpu.dimension_semantics<parallel>], iteration_bounds = array<i64: 1>, scalar_prefetch = 0 : i64, scratch_operands = 0 : i64, tpu.core_type = #tpu.core_type<tc>, window_params = [{pipeline_mode = #tpu.pipeline_mode<synchronous>, transform_indices = @transform_0, window_bounds = array<i64: 80, 196>}, {pipeline_mode = #tpu.pipeline_mode<synchronous>, transform_indices = @transform_1, window_bounds = array<i64: 80, 196>}, {transform_indices = @transform_2, window_bounds = array<i64: 480, 80>}, {transform_indices = @transform_3, window_bounds = array<i64: 480, 196>}]} {
    %c0 = arith.constant 0 : index
    %c0_0 = arith.constant 0 : index
    %0 = vector.load %arg1[%c0, %c0_0] : memref<80x196xf32, #tpu.memory_space<vmem>>, vector<80x196xf32>
    %c0_1 = arith.constant 0 : index
    %c0_2 = arith.constant 0 : index
    %1 = vector.load %arg2[%c0_1, %c0_2] : memref<80x196xf32, #tpu.memory_space<vmem>>, vector<80x196xf32>
    %2 = arith.addf %0, %1 : vector<80x196xf32>
    %3 = arith.truncf %2 : vector<80x196xf32> to vector<80x196xbf16>
    %c0_3 = arith.constant 0 : index
    %c0_4 = arith.constant 0 : index
    %4 = vector.load %arg3[%c0_3, %c0_4] : memref<480x80xbf16, #tpu.memory_space<vmem>>, vector<480x80xbf16>
    %cst = arith.constant dense<0.000000e+00> : vector<480x196xf32>
    %5 = tpu.matmul %4, %3, %cst {dimension_numbers = #tpu.dot_dimension_numbers<[1], [0], [0], [1], [0, 0, 1, 1], [], []>} : vector<480x80xbf16>, vector<80x196xbf16>, vector<480x196xf32> -> vector<480x196xf32>
    %c0_5 = arith.constant 0 : index
    %c0_6 = arith.constant 0 : index
    %6 = vector.load %arg4[%c0_5, %c0_6] : memref<480x196xf32, #tpu.memory_space<vmem>>, vector<480x196xf32>
    tpu.vector_store %arg4[%c0_5, %c0_6], %5 {strides = array<i32>} : memref<480x196xf32, #tpu.memory_space<vmem>>, vector<480x196xf32>,
    return
  }
  func.func @transform_0(%arg0: i32) -> (i32, i32) {
    %c0_i32 = arith.constant 0 : i32
    %c0_i32_0 = arith.constant 0 : i32
    %c0_i32_1 = arith.constant 0 : i32
    return %c0_i32, %c0_i32_0 : i32, i32
  }
  func.func @transform_1(%arg0: i32) -> (i32, i32) {
    %c0_i32 = arith.constant 0 : i32
    %c0_i32_0 = arith.constant 0 : i32
    %c0_i32_1 = arith.constant 0 : i32
    return %c0_i32, %c0_i32_0 : i32, i32
  }
  func.func @transform_2(%arg0: i32) -> (i32, i32) {
    %c0_i32 = arith.constant 0 : i32
    %c0_i32_0 = arith.constant 0 : i32
    return %arg0, %c0_i32 : i32, i32
  }
  func.func @transform_3(%arg0: i32) -> (i32, i32) {
    %c0_i32 = arith.constant 0 : i32
    %c0_i32_0 = arith.constant 0 : i32
    return %arg0, %c0_i32 : i32, i32
  }
}

</mosaic_0001>

<bundles_post_ra>
// kernel: forward.1
= control target key start
LH: loop header
LB: loop body
LE: loop exit
PB: predicated region body
PF: predicated region fallthrough
CT: control target
= control target key end

     0   :  { %v945_v3 = vmov 0   ;;  %vm295_vm0 = vcmask 654336   ;;  %vm720_vm1 = vcmask 556032   ;;  %s1656_s0 = inlined_call_operand.vmem [shape: f32[80,196], index: 0, kind: input, shape index: {}]   ;;  %s1657_s1 = inlined_call_operand.vmem [shape: f32[80,196], index: 1, kind: input, shape index: {}]   ;;  %s1658_s2 = inlined_call_operand.vmem [shape: bf16[480,80], index: 2, kind: input, shape index: {}]   ;;  %s1659_s3 = inlined_call_operand.vmem [shape: f32[480,196], index: 3, kind: output, shape index: {}]  }
   0x1   :  { %v16_v0 = vld [vmem:[%s1656_s0 + $0x8] sm:$0xff]  ;;  %v18_v1 = vld [vmem:[%s1656_s0 + $0x18] sm:$0xff]  ;;  %418 = vmatprep.mubr.bf16.mxu0 %v945_v3  ;;  %568 = vmatprep.mubr.bf16.mxu1 %v945_v3  ;;  %v15_v6 = vld [vmem:[%s1656_s0] sm:$0xff] }
   0x2   :  { %v36_v2 = vld [vmem:[%s1657_s1 + $0x8] sm:$0xff]  ;;  %v38_v4 = vld [vmem:[%s1657_s1 + $0x18] sm:$0xff]  ;;  %v17_v7 = vld [vmem:[%s1656_s0 + $0x10] sm:$0xff] }
   0x3   :  { %v56_v5 = vadd.f32 %v36_v2, %v16_v0  ;;  %v58_v8 = vadd.f32 %v38_v4, %v18_v1  ;;  %v35_v9 = vld [vmem:[%s1657_s1] sm:$0xff]  ;;  %v37_v10 = vld [vmem:[%s1657_s1 + $0x10] sm:$0xff]  ;;  %v20_v11 = vld [vmem:[%s1656_s0 + $0x28] sm:$0xff] }
   0x4   :  { %v55_v12 = vadd.f32 %v35_v9, %v15_v6  ;;  %v57_v13 = vadd.f32 %v37_v10, %v17_v7  ;;  %v22_v14 = vld [vmem:[%s1656_s0 + $0x38] sm:$0xff]  ;;  %v40_v15 = vld [vmem:[%s1657_s1 + $0x28] sm:$0xff]  ;;  %v19_v20 = vld [vmem:[%s1656_s0 + $0x20] sm:$0xff] }
   0x5   :  { %v42_v16 = vld [vmem:[%s1657_s1 + $0x38] sm:$0xff]  ;;  %v76_v17 = vpack.c.bf16 %v58_v8, %v56_v5  ;;  %v60_v18 = vadd.f32 %v40_v15, %v20_v11  ;;  %v21_v21 = vld [vmem:[%s1656_s0 + $0x30] sm:$0xff]  ;;  %v39_v22 = vld [vmem:[%s1657_s1 + $0x20] sm:$0xff] }
   0x6   :  { %v62_v19 = vadd.f32 %v42_v16, %v22_v14  ;;  %v75_v23 = vpack.c.bf16 %v57_v13, %v55_v12  ;;  %v41_v24 = vld [vmem:[%s1657_s1 + $0x30] sm:$0xff]  ;;  %v59_v25 = vadd.f32 %v39_v22, %v19_v20  ;;  %v24_v26 = vld [vmem:[%s1656_s0 + $0x48] sm:$0xff]  ;;  %v26_v27 = vld [vmem:[%s1656_s0 + $0x58] sm:$0xff] }
   0x7   :  { %386 = vmatprep.subr.bf16.mxu0 %v76_v17  ;;  %904 = vmatprep.subr.bf16.mxu1 %v76_v17  ;;  %v61_v29 = vadd.f32 %v41_v24, %v21_v21  ;;  %v44_v30 = vld [vmem:[%s1657_s1 + $0x48] sm:$0xff]  ;;  %v46_v31 = vld [vmem:[%s1657_s1 + $0x58] sm:$0xff]  ;;  %v23_v32 = vld [vmem:[%s1656_s0 + $0x40] sm:$0xff] }
   0x8   :  { %v78_v28 = vpack.c.bf16 %v62_v19, %v60_v18  ;;  %387 = vmatpush1.bf16.msra.mxu0 %v75_v23  ;;  %909 = vmatpush1.bf16.msra.mxu1 %v75_v23  ;;  %v64_v33 = vadd.f32 %v44_v30, %v24_v26  ;;  %v66_v34 = vadd.f32 %v46_v31, %v26_v27  ;;  %v25_v35 = vld [vmem:[%s1656_s0 + $0x50] sm:$0xff]  ;;  %v43_v36 = vld [vmem:[%s1657_s1 + $0x40] sm:$0xff]  ;;  %v28_v41 = vld [vmem:[%s1656_s0 + $0x68] sm:$0xff] }
   0x9   :  { %v45_v37 = vld [vmem:[%s1657_s1 + $0x50] sm:$0xff]  ;;  %v77_v38 = vpack.c.bf16 %v61_v29, %v59_v25  ;;  %v63_v39 = vadd.f32 %v43_v36, %v23_v32  ;;  %v30_v42 = vld [vmem:[%s1656_s0 + $0x78] sm:$0xff]  ;;  %v48_v43 = vld [vmem:[%s1657_s1 + $0x68] sm:$0xff] }
   0xa   :  { %388 = vmatprep.subr.bf16.mxu0 %v78_v28  ;;  %905 = vmatprep.subr.bf16.mxu1 %v78_v28  ;;  %v65_v40 = vadd.f32 %v45_v37, %v25_v35  ;;  %v80_v44 = vpack.c.bf16 %v66_v34, %v64_v33  ;;  %v50_v45 = vld [vmem:[%s1657_s1 + $0x78] sm:$0xff]  ;;  %v68_v46 = vadd.f32 %v48_v43, %v28_v41  ;;  %v27_v47 = vld [vmem:[%s1656_s0 + $0x60] sm:$0xff]  ;;  %v29_v48 = vld [vmem:[%s1656_s0 + $0x70] sm:$0xff] }
   0xb   :  { %v70_v49 = vadd.f32 %v50_v45, %v30_v42  ;;  %v47_v50 = vld [vmem:[%s1657_s1 + $0x60] sm:$0xff]  ;;  %v49_v51 = vld [vmem:[%s1657_s1 + $0x70] sm:$0xff]  ;;  %v32_v52 = vld [vmem:[%s1656_s0 + $0x88] sm:$0xff] }
   0xc   :  { %389 = vmatpush1.bf16.msra.mxu0 %v77_v38  ;;  %910 = vmatpush1.bf16.msra.mxu1 %v77_v38  ;;  %v79_v53 = vpack.c.bf16 %v65_v40, %v63_v39  ;;  %v67_v54 = vadd.f32 %v47_v50, %v27_v47  ;;  %v69_v55 = vadd.f32 %v49_v51, %v29_v48  ;;  %v34_v56 = vld [vmem:[%s1656_s0 + $0x98] sm:$0xff]  ;;  %v52_v57 = vld [vmem:[%s1657_s1 + $0x88] sm:$0xff]  ;;  %v31_v62 = vld [vmem:[%s1656_s0 + $0x80] sm:$0xff] }
   0xd   :  { %v54_v58 = vld [vmem:[%s1657_s1 + $0x98] sm:$0xff]  ;;  %390 = vmatprep.subr.bf16.mxu0 %v80_v44  ;;  %906 = vmatprep.subr.bf16.mxu1 %v80_v44  ;;  %v82_v59 = vpack.c.bf16 %v70_v49, %v68_v46  ;;  %v72_v60 = vadd.f32 %v52_v57, %v32_v52  ;;  %v33_v63 = vld [vmem:[%s1656_s0 + $0x90] sm:$0xff]  ;;  %v51_v0 = vld [vmem:[%s1657_s1 + $0x80] sm:$0xff] }
   0xe   :  { %v74_v61 = vadd.f32 %v54_v58, %v34_v56  ;;  %v53_v1 = vld [vmem:[%s1657_s1 + $0x90] sm:$0xff]  ;;  %v81_v2 = vpack.c.bf16 %v69_v55, %v67_v54  ;;  %v71_v4 = vadd.f32 %v51_v0, %v31_v62  ;;  %v915_v8 = vld [vmem:[%s1658_s2] sm:$0xff]   ;;  %v916_v9 = vld [vmem:[%s1658_s2 + $0x78] sm:$0xff]  }
   0xf   :  { %v73_v5 = vadd.f32 %v53_v1, %v33_v63  ;;  %v917_v10 = vld [vmem:[%s1658_s2 + $0x8] sm:$0xff]   ;;  %v918_v11 = vld [vmem:[%s1658_s2 + $0x80] sm:$0xff]   ;;  %v919_v12 = vld [vmem:[%s1658_s2 + $0x10] sm:$0xff]  }
  0x10   :  { %391 = vmatpush1.bf16.msra.mxu0 %v79_v53  ;;  %911 = vmatpush1.bf16.msra.mxu1 %v79_v53  ;;  %v84_v6 = vpack.c.bf16 %v74_v61, %v72_v60  ;;  %v920_v13 = vld [vmem:[%s1658_s2 + $0x88] sm:$0xff]   ;;  %v921_v14 = vld [vmem:[%s1658_s2 + $0x18] sm:$0xff]   ;;  %v922_v15 = vld [vmem:[%s1658_s2 + $0x90] sm:$0xff]  }
  0x11   :  { %392 = vmatprep.subr.bf16.mxu0 %v82_v59  ;;  %907 = vmatprep.subr.bf16.mxu1 %v82_v59  ;;  %v83_v7 = vpack.c.bf16 %v73_v5, %v71_v4  ;;  %v923_v16 = vld [vmem:[%s1658_s2 + $0x20] sm:$0xff]   ;;  %v924_v17 = vld [vmem:[%s1658_s2 + $0x98] sm:$0xff]   ;;  %v925_v18 = vld [vmem:[%s1658_s2 + $0x28] sm:$0xff]  }
  0x12   :  { %v926_v19 = vld [vmem:[%s1658_s2 + $0xa0] sm:$0xff]   ;;  %v927_v20 = vld [vmem:[%s1658_s2 + $0x30] sm:$0xff]   ;;  %v928_v21 = vld [vmem:[%s1658_s2 + $0xa8] sm:$0xff]  }
  0x13   :  { %v929_v22 = vld [vmem:[%s1658_s2 + $0x38] sm:$0xff]   ;;  %v930_v23 = vld [vmem:[%s1658_s2 + $0xb0] sm:$0xff]   ;;  %v931_v24 = vld [vmem:[%s1658_s2 + $0x40] sm:$0xff]  }
  0x14   :  { %393 = vmatpush1.bf16.msra.mxu0 %v81_v2  ;;  %912 = vmatpush1.bf16.msra.mxu1 %v81_v2  ;;  %v932_v25 = vld [vmem:[%s1658_s2 + $0xb8] sm:$0xff]   ;;  %v933_v26 = vld [vmem:[%s1658_s2 + $0x48] sm:$0xff]   ;;  %v934_v27 = vld [vmem:[%s1658_s2 + $0xc0] sm:$0xff]  }
  0x15   :  { %394 = vmatprep.subr.bf16.mxu0 %v84_v6  ;;  %908 = vmatprep.subr.bf16.mxu1 %v84_v6  ;;  %v935_v28 = vld [vmem:[%s1658_s2 + $0x50] sm:$0xff]   ;;  %v936_v29 = vld [vmem:[%s1658_s2 + $0xc8] sm:$0xff]   ;;  %v937_v30 = vld [vmem:[%s1658_s2 + $0x58] sm:$0xff]  }
  0x16   :  { %v938_v31 = vld [vmem:[%s1658_s2 + $0xd0] sm:$0xff]   ;;  %v939_v32 = vld [vmem:[%s1658_s2 + $0x60] sm:$0xff]   ;;  %v940_v33 = vld [vmem:[%s1658_s2 + $0xd8] sm:$0xff]  }
  0x17   :  { %v941_v34 = vld [vmem:[%s1658_s2 + $0x68] sm:$0xff]   ;;  %v942_v35 = vld [vmem:[%s1658_s2 + $0xe0] sm:$0xff]   ;;  %v943_v36 = vld [vmem:[%s1658_s2 + $0x70] sm:$0xff]  }
  0x18   :  { %395 = vmatpush1.bf16.msra.mxu0 %v83_v7  ;;  %913 = vmatpush1.bf16.msra.mxu1 %v83_v7  ;;  %v944_v37 = vld [vmem:[%s1658_s2 + $0xe8] sm:$0xff]  }
  0x1b   :  { %874 = vmatmul.mubr.msk.bf16.vlgmr.msra.gmra.mrb[0].mxu0 %vm295_vm0, %v915_v8  ;;  %889 = vmatmul.mubr.msk.bf16.vlgmr.msra.gmra.mrb[0].mxu1 %vm295_vm0, %v916_v9 }
  0x1c   :  { %428 = vmatprep.mubr.bf16.mxu0 %v945_v3  ;;  %578 = vmatprep.mubr.bf16.mxu1 %v945_v3 }
  0x23   :  { %875 = vmatmul.mubr.msk.bf16.gmra.mrb[4].mxu0 %vm295_vm0, %v917_v10  ;;  %890 = vmatmul.mubr.msk.bf16.gmra.mrb[4].mxu1 %vm295_vm0, %v918_v11 }
  0x24   :  { %438 = vmatprep.mubr.bf16.mxu0 %v945_v3  ;;  %588 = vmatprep.mubr.bf16.mxu1 %v945_v3 }
  0x2b   :  { %876 = vmatmul.mubr.msk.bf16.gmra.mrb[8].mxu0 %vm295_vm0, %v919_v12  ;;  %891 = vmatmul.mubr.msk.bf16.gmra.mrb[8].mxu1 %vm295_vm0, %v920_v13 }
  0x2c   :  { %448 = vmatprep.mubr.bf16.mxu0 %v945_v3  ;;  %598 = vmatprep.mubr.bf16.mxu1 %v945_v3 }
  0x33   :  { %877 = vmatmul.mubr.msk.bf16.gmra.mrb[12].mxu0 %vm295_vm0, %v921_v14  ;;  %892 = vmatmul.mubr.msk.bf16.gmra.mrb[12].mxu1 %vm295_vm0, %v922_v15 }
  0x34   :  { %458 = vmatprep.mubr.bf16.mxu0 %v945_v3  ;;  %608 = vmatprep.mubr.bf16.mxu1 %v945_v3 }
  0x3b   :  { %878 = vmatmul.mubr.msk.bf16.gmra.mrb[16].mxu0 %vm295_vm0, %v923_v16  ;;  %893 = vmatmul.mubr.msk.bf16.gmra.mrb[16].mxu1 %vm295_vm0, %v924_v17 }
  0x3c   :  { %468 = vmatprep.mubr.bf16.mxu0 %v945_v3  ;;  %618 = vmatprep.mubr.bf16.mxu1 %v945_v3 }
  0x43   :  { %879 = vmatmul.mubr.msk.bf16.gmra.mrb[20].mxu0 %vm295_vm0, %v925_v18  ;;  %894 = vmatmul.mubr.msk.bf16.gmra.mrb[20].mxu1 %vm295_vm0, %v926_v19 }
  0x44   :  { %478 = vmatprep.mubr.bf16.mxu0 %v945_v3  ;;  %628 = vmatprep.mubr.bf16.mxu1 %v945_v3 }
  0x4b   :  { %880 = vmatmul.mubr.msk.bf16.gmra.mrb[24].mxu0 %vm295_vm0, %v927_v20  ;;  %895 = vmatmul.mubr.msk.bf16.gmra.mrb[24].mxu1 %vm295_vm0, %v928_v21 }
  0x4c   :  { %488 = vmatprep.mubr.bf16.mxu0 %v945_v3  ;;  %638 = vmatprep.mubr.bf16.mxu1 %v945_v3 }
  0x53   :  { %881 = vmatmul.mubr.msk.bf16.gmra.mrb[28].mxu0 %vm295_vm0, %v929_v22  ;;  %896 = vmatmul.mubr.msk.bf16.gmra.mrb[28].mxu1 %vm295_vm0, %v930_v23 }
  0x54   :  { %498 = vmatprep.mubr.bf16.mxu0 %v945_v3  ;;  %648 = vmatprep.mubr.bf16.mxu1 %v945_v3 }
  0x5b   :  { %882 = vmatmul.mubr.msk.bf16.gmra.mrb[32].mxu0 %vm295_vm0, %v931_v24  ;;  %897 = vmatmul.mubr.msk.bf16.gmra.mrb[32].mxu1 %vm295_vm0, %v932_v25 }
  0x5c   :  { %508 = vmatprep.mubr.bf16.mxu0 %v945_v3  ;;  %658 = vmatprep.mubr.bf16.mxu1 %v945_v3 }
  0x63   :  { %883 = vmatmul.mubr.msk.bf16.gmra.mrb[36].mxu0 %vm295_vm0, %v933_v26  ;;  %898 = vmatmul.mubr.msk.bf16.gmra.mrb[36].mxu1 %vm295_vm0, %v934_v27 }
  0x64   :  { %518 = vmatprep.mubr.bf16.mxu0 %v945_v3  ;;  %668 = vmatprep.mubr.bf16.mxu1 %v945_v3 }
  0x6b   :  { %884 = vmatmul.mubr.msk.bf16.gmra.mrb[40].mxu0 %vm295_vm0, %v935_v28  ;;  %899 = vmatmul.mubr.msk.bf16.gmra.mrb[40].mxu1 %vm295_vm0, %v936_v29 }
  0x6c   :  { %528 = vmatprep.mubr.bf16.mxu0 %v945_v3  ;;  %678 = vmatprep.mubr.bf16.mxu1 %v945_v3 }
  0x73   :  { %885 = vmatmul.mubr.msk.bf16.gmra.mrb[44].mxu0 %vm295_vm0, %v937_v30  ;;  %900 = vmatmul.mubr.msk.bf16.gmra.mrb[44].mxu1 %vm295_vm0, %v938_v31 }
  0x74   :  { %538 = vmatprep.mubr.bf16.mxu0 %v945_v3  ;;  %688 = vmatprep.mubr.bf16.mxu1 %v945_v3 }
  0x7b   :  { %886 = vmatmul.mubr.msk.bf16.gmra.mrb[48].mxu0 %vm295_vm0, %v939_v32  ;;  %901 = vmatmul.mubr.msk.bf16.gmra.mrb[48].mxu1 %vm295_vm0, %v940_v33 }
  0x7c   :  { %548 = vmatprep.mubr.bf16.mxu0 %v945_v3  ;;  %698 = vmatprep.mubr.bf16.mxu1 %v945_v3 }
  0x83   :  { %887 = vmatmul.mubr.msk.bf16.gmra.mrb[52].mxu0 %vm295_vm0, %v941_v34  ;;  %902 = vmatmul.mubr.msk.bf16.gmra.mrb[52].mxu1 %vm295_vm0, %v942_v35 }
  0x84   :  { %558 = vmatprep.mubr.bf16.mxu0 %v945_v3  ;;  %708 = vmatprep.mubr.bf16.mxu1 %v945_v3 }
  0x8b   :  { %888 = vmatmul.mubr.msk.bf16.gmra.mrb[56].mxu0 %vm295_vm0, %v943_v36  ;;  %903 = vmatmul.mubr.msk.bf16.gmra.mrb[56].mxu1 %vm295_vm0, %v944_v37 }
  0xee   :  { %v420_v38 = vpop.f32.mrb[0].mxu0  ;;  %v570_v39 = vpop.f32.mrb[0].mxu1 }
  0xef   :  { %719 = vst [vmem:[%s1659_s3] sm:$0xff] %v420_v38  ;;  %780 = vst [vmem:[%s1659_s3 + $0x1e0] sm:$0xff] %v570_v39  ;;  %v422_v3 = vpop.f32.mrb[1].mxu0  ;;  %v572_v40 = vpop.f32.mrb[1].mxu1 }
  0xf0   :  { %721 = vst.msk [vmem:[%s1659_s3 + $0x8] sm:$0xff] %vm720_vm1, %v422_v3  ;;  %781 = vst.msk [vmem:[%s1659_s3 + $0x1e8] sm:$0xff] %vm720_vm1, %v572_v40  ;;  %v424_v41 = vpop.f32.mrb[2].mxu0  ;;  %v574_v42 = vpop.f32.mrb[2].mxu1 }
  0xf1   :  { %722 = vst [vmem:[%s1659_s3 + $0x10] sm:$0xff] %v424_v41  ;;  %782 = vst [vmem:[%s1659_s3 + $0x1f0] sm:$0xff] %v574_v42  ;;  %v426_v43 = vpop.f32.mrb[3].mxu0  ;;  %v576_v44 = vpop.f32.mrb[3].mxu1 }
  0xf2   :  { %723 = vst.msk [vmem:[%s1659_s3 + $0x18] sm:$0xff] %vm720_vm1, %v426_v43  ;;  %783 = vst.msk [vmem:[%s1659_s3 + $0x1f8] sm:$0xff] %vm720_vm1, %v576_v44 }
  0xf6   :  { %v430_v45 = vpop.f32.mrb[4].mxu0  ;;  %v580_v46 = vpop.f32.mrb[4].mxu1 }
  0xf7   :  { %724 = vst [vmem:[%s1659_s3 + $0x20] sm:$0xff] %v430_v45  ;;  %784 = vst [vmem:[%s1659_s3 + $0x200] sm:$0xff] %v580_v46  ;;  %v432_v47 = vpop.f32.mrb[5].mxu0  ;;  %v582_v48 = vpop.f32.mrb[5].mxu1 }
  0xf8   :  { %725 = vst.msk [vmem:[%s1659_s3 + $0x28] sm:$0xff] %vm720_vm1, %v432_v47  ;;  %785 = vst.msk [vmem:[%s1659_s3 + $0x208] sm:$0xff] %vm720_vm1, %v582_v48  ;;  %v434_v49 = vpop.f32.mrb[6].mxu0  ;;  %v584_v50 = vpop.f32.mrb[6].mxu1 }
  0xf9   :  { %726 = vst [vmem:[%s1659_s3 + $0x30] sm:$0xff] %v434_v49  ;;  %786 = vst [vmem:[%s1659_s3 + $0x210] sm:$0xff] %v584_v50  ;;  %v436_v51 = vpop.f32.mrb[7].mxu0  ;;  %v586_v52 = vpop.f32.mrb[7].mxu1 }
  0xfa   :  { %727 = vst.msk [vmem:[%s1659_s3 + $0x38] sm:$0xff] %vm720_vm1, %v436_v51  ;;  %787 = vst.msk [vmem:[%s1659_s3 + $0x218] sm:$0xff] %vm720_vm1, %v586_v52 }
  0xfe   :  { %v440_v53 = vpop.f32.mrb[8].mxu0  ;;  %v590_v54 = vpop.f32.mrb[8].mxu1 }
  0xff   :  { %728 = vst [vmem:[%s1659_s3 + $0x40] sm:$0xff] %v440_v53  ;;  %788 = vst [vmem:[%s1659_s3 + $0x220] sm:$0xff] %v590_v54  ;;  %v442_v55 = vpop.f32.mrb[9].mxu0  ;;  %v592_v56 = vpop.f32.mrb[9].mxu1 }
 0x100   :  { %729 = vst.msk [vmem:[%s1659_s3 + $0x48] sm:$0xff] %vm720_vm1, %v442_v55  ;;  %789 = vst.msk [vmem:[%s1659_s3 + $0x228] sm:$0xff] %vm720_vm1, %v592_v56  ;;  %v444_v57 = vpop.f32.mrb[10].mxu0  ;;  %v594_v58 = vpop.f32.mrb[10].mxu1 }
 0x101   :  { %730 = vst [vmem:[%s1659_s3 + $0x50] sm:$0xff] %v444_v57  ;;  %790 = vst [vmem:[%s1659_s3 + $0x230] sm:$0xff] %v594_v58  ;;  %v446_v59 = vpop.f32.mrb[11].mxu0  ;;  %v596_v60 = vpop.f32.mrb[11].mxu1 }
 0x102   :  { %731 = vst.msk [vmem:[%s1659_s3 + $0x58] sm:$0xff] %vm720_vm1, %v446_v59  ;;  %791 = vst.msk [vmem:[%s1659_s3 + $0x238] sm:$0xff] %vm720_vm1, %v596_v60 }
 0x106   :  { %v450_v61 = vpop.f32.mrb[12].mxu0  ;;  %v600_v62 = vpop.f32.mrb[12].mxu1 }
 0x107   :  { %732 = vst [vmem:[%s1659_s3 + $0x60] sm:$0xff] %v450_v61  ;;  %792 = vst [vmem:[%s1659_s3 + $0x240] sm:$0xff] %v600_v62  ;;  %v452_v63 = vpop.f32.mrb[13].mxu0  ;;  %v602_v0 = vpop.f32.mrb[13].mxu1 }
 0x108   :  { %733 = vst.msk [vmem:[%s1659_s3 + $0x68] sm:$0xff] %vm720_vm1, %v452_v63  ;;  %793 = vst.msk [vmem:[%s1659_s3 + $0x248] sm:$0xff] %vm720_vm1, %v602_v0  ;;  %v454_v1 = vpop.f32.mrb[14].mxu0  ;;  %v604_v2 = vpop.f32.mrb[14].mxu1 }
 0x109   :  { %734 = vst [vmem:[%s1659_s3 + $0x70] sm:$0xff] %v454_v1  ;;  %794 = vst [vmem:[%s1659_s3 + $0x250] sm:$0xff] %v604_v2  ;;  %v456_v4 = vpop.f32.mrb[15].mxu0  ;;  %v606_v5 = vpop.f32.mrb[15].mxu1 }
 0x10a   :  { %735 = vst.msk [vmem:[%s1659_s3 + $0x78] sm:$0xff] %vm720_vm1, %v456_v4  ;;  %795 = vst.msk [vmem:[%s1659_s3 + $0x258] sm:$0xff] %vm720_vm1, %v606_v5 }
 0x10e   :  { %v460_v6 = vpop.f32.mrb[16].mxu0  ;;  %v610_v7 = vpop.f32.mrb[16].mxu1 }
 0x10f   :  { %736 = vst [vmem:[%s1659_s3 + $0x80] sm:$0xff] %v460_v6  ;;  %796 = vst [vmem:[%s1659_s3 + $0x260] sm:$0xff] %v610_v7  ;;  %v462_v8 = vpop.f32.mrb[17].mxu0  ;;  %v612_v9 = vpop.f32.mrb[17].mxu1 }
 0x110   :  { %737 = vst.msk [vmem:[%s1659_s3 + $0x88] sm:$0xff] %vm720_vm1, %v462_v8  ;;  %797 = vst.msk [vmem:[%s1659_s3 + $0x268] sm:$0xff] %vm720_vm1, %v612_v9  ;;  %v464_v10 = vpop.f32.mrb[18].mxu0  ;;  %v614_v11 = vpop.f32.mrb[18].mxu1 }
 0x111   :  { %738 = vst [vmem:[%s1659_s3 + $0x90] sm:$0xff] %v464_v10  ;;  %798 = vst [vmem:[%s1659_s3 + $0x270] sm:$0xff] %v614_v11  ;;  %v466_v12 = vpop.f32.mrb[19].mxu0  ;;  %v616_v13 = vpop.f32.mrb[19].mxu1 }
 0x112   :  { %739 = vst.msk [vmem:[%s1659_s3 + $0x98] sm:$0xff] %vm720_vm1, %v466_v12  ;;  %799 = vst.msk [vmem:[%s1659_s3 + $0x278] sm:$0xff] %vm720_vm1, %v616_v13 }
 0x116   :  { %v470_v14 = vpop.f32.mrb[20].mxu0  ;;  %v620_v15 = vpop.f32.mrb[20].mxu1 }
 0x117   :  { %740 = vst [vmem:[%s1659_s3 + $0xa0] sm:$0xff] %v470_v14  ;;  %800 = vst [vmem:[%s1659_s3 + $0x280] sm:$0xff] %v620_v15  ;;  %v472_v16 = vpop.f32.mrb[21].mxu0  ;;  %v622_v17 = vpop.f32.mrb[21].mxu1 }
 0x118   :  { %741 = vst.msk [vmem:[%s1659_s3 + $0xa8] sm:$0xff] %vm720_vm1, %v472_v16  ;;  %801 = vst.msk [vmem:[%s1659_s3 + $0x288] sm:$0xff] %vm720_vm1, %v622_v17  ;;  %v474_v18 = vpop.f32.mrb[22].mxu0  ;;  %v624_v19 = vpop.f32.mrb[22].mxu1 }
 0x119   :  { %742 = vst [vmem:[%s1659_s3 + $0xb0] sm:$0xff] %v474_v18  ;;  %802 = vst [vmem:[%s1659_s3 + $0x290] sm:$0xff] %v624_v19  ;;  %v476_v20 = vpop.f32.mrb[23].mxu0  ;;  %v626_v21 = vpop.f32.mrb[23].mxu1 }
 0x11a   :  { %743 = vst.msk [vmem:[%s1659_s3 + $0xb8] sm:$0xff] %vm720_vm1, %v476_v20  ;;  %803 = vst.msk [vmem:[%s1659_s3 + $0x298] sm:$0xff] %vm720_vm1, %v626_v21 }
 0x11e   :  { %v480_v22 = vpop.f32.mrb[24].mxu0  ;;  %v630_v23 = vpop.f32.mrb[24].mxu1 }
 0x11f   :  { %744 = vst [vmem:[%s1659_s3 + $0xc0] sm:$0xff] %v480_v22  ;;  %804 = vst [vmem:[%s1659_s3 + $0x2a0] sm:$0xff] %v630_v23  ;;  %v482_v24 = vpop.f32.mrb[25].mxu0  ;;  %v632_v25 = vpop.f32.mrb[25].mxu1 }
 0x120   :  { %745 = vst.msk [vmem:[%s1659_s3 + $0xc8] sm:$0xff] %vm720_vm1, %v482_v24  ;;  %805 = vst.msk [vmem:[%s1659_s3 + $0x2a8] sm:$0xff] %vm720_vm1, %v632_v25  ;;  %v484_v26 = vpop.f32.mrb[26].mxu0  ;;  %v634_v27 = vpop.f32.mrb[26].mxu1 }
 0x121   :  { %746 = vst [vmem:[%s1659_s3 + $0xd0] sm:$0xff] %v484_v26  ;;  %806 = vst [vmem:[%s1659_s3 + $0x2b0] sm:$0xff] %v634_v27  ;;  %v486_v28 = vpop.f32.mrb[27].mxu0  ;;  %v636_v29 = vpop.f32.mrb[27].mxu1 }
 0x122   :  { %747 = vst.msk [vmem:[%s1659_s3 + $0xd8] sm:$0xff] %vm720_vm1, %v486_v28  ;;  %807 = vst.msk [vmem:[%s1659_s3 + $0x2b8] sm:$0xff] %vm720_vm1, %v636_v29 }
 0x126   :  { %v490_v30 = vpop.f32.mrb[28].mxu0  ;;  %v640_v31 = vpop.f32.mrb[28].mxu1 }
 0x127   :  { %748 = vst [vmem:[%s1659_s3 + $0xe0] sm:$0xff] %v490_v30  ;;  %808 = vst [vmem:[%s1659_s3 + $0x2c0] sm:$0xff] %v640_v31  ;;  %v492_v32 = vpop.f32.mrb[29].mxu0  ;;  %v642_v33 = vpop.f32.mrb[29].mxu1 }
 0x128   :  { %749 = vst.msk [vmem:[%s1659_s3 + $0xe8] sm:$0xff] %vm720_vm1, %v492_v32  ;;  %809 = vst.msk [vmem:[%s1659_s3 + $0x2c8] sm:$0xff] %vm720_vm1, %v642_v33  ;;  %v494_v34 = vpop.f32.mrb[30].mxu0  ;;  %v644_v35 = vpop.f32.mrb[30].mxu1 }
 0x129   :  { %750 = vst [vmem:[%s1659_s3 + $0xf0] sm:$0xff] %v494_v34  ;;  %810 = vst [vmem:[%s1659_s3 + $0x2d0] sm:$0xff] %v644_v35  ;;  %v496_v36 = vpop.f32.mrb[31].mxu0  ;;  %v646_v37 = vpop.f32.mrb[31].mxu1 }
 0x12a   :  { %751 = vst.msk [vmem:[%s1659_s3 + $0xf8] sm:$0xff] %vm720_vm1, %v496_v36  ;;  %811 = vst.msk [vmem:[%s1659_s3 + $0x2d8] sm:$0xff] %vm720_vm1, %v646_v37 }
 0x12e   :  { %v500_v38 = vpop.f32.mrb[32].mxu0  ;;  %v650_v39 = vpop.f32.mrb[32].mxu1 }
 0x12f   :  { %752 = vst [vmem:[%s1659_s3 + $0x100] sm:$0xff] %v500_v38  ;;  %812 = vst [vmem:[%s1659_s3 + $0x2e0] sm:$0xff] %v650_v39  ;;  %v502_v3 = vpop.f32.mrb[33].mxu0  ;;  %v652_v40 = vpop.f32.mrb[33].mxu1 }
 0x130   :  { %753 = vst.msk [vmem:[%s1659_s3 + $0x108] sm:$0xff] %vm720_vm1, %v502_v3  ;;  %813 = vst.msk [vmem:[%s1659_s3 + $0x2e8] sm:$0xff] %vm720_vm1, %v652_v40  ;;  %v504_v41 = vpop.f32.mrb[34].mxu0  ;;  %v654_v42 = vpop.f32.mrb[34].mxu1 }
 0x131   :  { %754 = vst [vmem:[%s1659_s3 + $0x110] sm:$0xff] %v504_v41  ;;  %814 = vst [vmem:[%s1659_s3 + $0x2f0] sm:$0xff] %v654_v42  ;;  %v506_v43 = vpop.f32.mrb[35].mxu0  ;;  %v656_v44 = vpop.f32.mrb[35].mxu1 }
 0x132   :  { %755 = vst.msk [vmem:[%s1659_s3 + $0x118] sm:$0xff] %vm720_vm1, %v506_v43  ;;  %815 = vst.msk [vmem:[%s1659_s3 + $0x2f8] sm:$0xff] %vm720_vm1, %v656_v44 }
 0x136   :  { %v510_v45 = vpop.f32.mrb[36].mxu0  ;;  %v660_v46 = vpop.f32.mrb[36].mxu1 }
 0x137   :  { %756 = vst [vmem:[%s1659_s3 + $0x120] sm:$0xff] %v510_v45  ;;  %816 = vst [vmem:[%s1659_s3 + $0x300] sm:$0xff] %v660_v46  ;;  %v512_v47 = vpop.f32.mrb[37].mxu0  ;;  %v662_v48 = vpop.f32.mrb[37].mxu1 }
 0x138   :  { %757 = vst.msk [vmem:[%s1659_s3 + $0x128] sm:$0xff] %vm720_vm1, %v512_v47  ;;  %817 = vst.msk [vmem:[%s1659_s3 + $0x308] sm:$0xff] %vm720_vm1, %v662_v48  ;;  %v514_v49 = vpop.f32.mrb[38].mxu0  ;;  %v664_v50 = vpop.f32.mrb[38].mxu1 }
 0x139   :  { %758 = vst [vmem:[%s1659_s3 + $0x130] sm:$0xff] %v514_v49  ;;  %818 = vst [vmem:[%s1659_s3 + $0x310] sm:$0xff] %v664_v50  ;;  %v516_v51 = vpop.f32.mrb[39].mxu0  ;;  %v666_v52 = vpop.f32.mrb[39].mxu1 }
 0x13a   :  { %759 = vst.msk [vmem:[%s1659_s3 + $0x138] sm:$0xff] %vm720_vm1, %v516_v51  ;;  %819 = vst.msk [vmem:[%s1659_s3 + $0x318] sm:$0xff] %vm720_vm1, %v666_v52 }
 0x13e   :  { %v520_v53 = vpop.f32.mrb[40].mxu0  ;;  %v670_v54 = vpop.f32.mrb[40].mxu1 }
 0x13f   :  { %760 = vst [vmem:[%s1659_s3 + $0x140] sm:$0xff] %v520_v53  ;;  %820 = vst [vmem:[%s1659_s3 + $0x320] sm:$0xff] %v670_v54  ;;  %v522_v55 = vpop.f32.mrb[41].mxu0  ;;  %v672_v56 = vpop.f32.mrb[41].mxu1 }
 0x140   :  { %761 = vst.msk [vmem:[%s1659_s3 + $0x148] sm:$0xff] %vm720_vm1, %v522_v55  ;;  %821 = vst.msk [vmem:[%s1659_s3 + $0x328] sm:$0xff] %vm720_vm1, %v672_v56  ;;  %v524_v57 = vpop.f32.mrb[42].mxu0  ;;  %v674_v58 = vpop.f32.mrb[42].mxu1 }
 0x141   :  { %762 = vst [vmem:[%s1659_s3 + $0x150] sm:$0xff] %v524_v57  ;;  %822 = vst [vmem:[%s1659_s3 + $0x330] sm:$0xff] %v674_v58  ;;  %v526_v59 = vpop.f32.mrb[43].mxu0  ;;  %v676_v60 = vpop.f32.mrb[43].mxu1 }
 0x142   :  { %763 = vst.msk [vmem:[%s1659_s3 + $0x158] sm:$0xff] %vm720_vm1, %v526_v59  ;;  %823 = vst.msk [vmem:[%s1659_s3 + $0x338] sm:$0xff] %vm720_vm1, %v676_v60 }
 0x146   :  { %v530_v61 = vpop.f32.mrb[44].mxu0  ;;  %v680_v62 = vpop.f32.mrb[44].mxu1 }
 0x147   :  { %764 = vst [vmem:[%s1659_s3 + $0x160] sm:$0xff] %v530_v61  ;;  %824 = vst [vmem:[%s1659_s3 + $0x340] sm:$0xff] %v680_v62  ;;  %v532_v63 = vpop.f32.mrb[45].mxu0  ;;  %v682_v0 = vpop.f32.mrb[45].mxu1 }
 0x148   :  { %765 = vst.msk [vmem:[%s1659_s3 + $0x168] sm:$0xff] %vm720_vm1, %v532_v63  ;;  %825 = vst.msk [vmem:[%s1659_s3 + $0x348] sm:$0xff] %vm720_vm1, %v682_v0  ;;  %v534_v1 = vpop.f32.mrb[46].mxu0  ;;  %v684_v2 = vpop.f32.mrb[46].mxu1 }
 0x149   :  { %766 = vst [vmem:[%s1659_s3 + $0x170] sm:$0xff] %v534_v1  ;;  %826 = vst [vmem:[%s1659_s3 + $0x350] sm:$0xff] %v684_v2  ;;  %v536_v4 = vpop.f32.mrb[47].mxu0  ;;  %v686_v5 = vpop.f32.mrb[47].mxu1 }
 0x14a   :  { %767 = vst.msk [vmem:[%s1659_s3 + $0x178] sm:$0xff] %vm720_vm1, %v536_v4  ;;  %827 = vst.msk [vmem:[%s1659_s3 + $0x358] sm:$0xff] %vm720_vm1, %v686_v5 }
 0x14e   :  { %v540_v6 = vpop.f32.mrb[48].mxu0  ;;  %v690_v7 = vpop.f32.mrb[48].mxu1 }
 0x14f   :  { %768 = vst [vmem:[%s1659_s3 + $0x180] sm:$0xff] %v540_v6  ;;  %828 = vst [vmem:[%s1659_s3 + $0x360] sm:$0xff] %v690_v7  ;;  %v542_v8 = vpop.f32.mrb[49].mxu0  ;;  %v692_v9 = vpop.f32.mrb[49].mxu1 }
 0x150   :  { %769 = vst.msk [vmem:[%s1659_s3 + $0x188] sm:$0xff] %vm720_vm1, %v542_v8  ;;  %829 = vst.msk [vmem:[%s1659_s3 + $0x368] sm:$0xff] %vm720_vm1, %v692_v9  ;;  %v544_v10 = vpop.f32.mrb[50].mxu0  ;;  %v694_v11 = vpop.f32.mrb[50].mxu1 }
 0x151   :  { %770 = vst [vmem:[%s1659_s3 + $0x190] sm:$0xff] %v544_v10  ;;  %830 = vst [vmem:[%s1659_s3 + $0x370] sm:$0xff] %v694_v11  ;;  %v546_v12 = vpop.f32.mrb[51].mxu0  ;;  %v696_v13 = vpop.f32.mrb[51].mxu1 }
 0x152   :  { %771 = vst.msk [vmem:[%s1659_s3 + $0x198] sm:$0xff] %vm720_vm1, %v546_v12  ;;  %831 = vst.msk [vmem:[%s1659_s3 + $0x378] sm:$0xff] %vm720_vm1, %v696_v13 }
 0x156   :  { %v550_v14 = vpop.f32.mrb[52].mxu0  ;;  %v700_v15 = vpop.f32.mrb[52].mxu1 }
 0x157   :  { %772 = vst [vmem:[%s1659_s3 + $0x1a0] sm:$0xff] %v550_v14  ;;  %832 = vst [vmem:[%s1659_s3 + $0x380] sm:$0xff] %v700_v15  ;;  %v552_v16 = vpop.f32.mrb[53].mxu0  ;;  %v702_v17 = vpop.f32.mrb[53].mxu1 }
 0x158   :  { %773 = vst.msk [vmem:[%s1659_s3 + $0x1a8] sm:$0xff] %vm720_vm1, %v552_v16  ;;  %833 = vst.msk [vmem:[%s1659_s3 + $0x388] sm:$0xff] %vm720_vm1, %v702_v17  ;;  %v554_v18 = vpop.f32.mrb[54].mxu0  ;;  %v704_v19 = vpop.f32.mrb[54].mxu1 }
 0x159   :  { %774 = vst [vmem:[%s1659_s3 + $0x1b0] sm:$0xff] %v554_v18  ;;  %834 = vst [vmem:[%s1659_s3 + $0x390] sm:$0xff] %v704_v19  ;;  %v556_v20 = vpop.f32.mrb[55].mxu0  ;;  %v706_v21 = vpop.f32.mrb[55].mxu1 }
 0x15a   :  { %775 = vst.msk [vmem:[%s1659_s3 + $0x1b8] sm:$0xff] %vm720_vm1, %v556_v20  ;;  %835 = vst.msk [vmem:[%s1659_s3 + $0x398] sm:$0xff] %vm720_vm1, %v706_v21 }
 0x15e   :  { %v560_v22 = vpop.f32.mrb[56].mxu0  ;;  %v710_v23 = vpop.f32.mrb[56].mxu1 }
 0x15f   :  { %776 = vst [vmem:[%s1659_s3 + $0x1c0] sm:$0xff] %v560_v22  ;;  %836 = vst [vmem:[%s1659_s3 + $0x3a0] sm:$0xff] %v710_v23  ;;  %v562_v24 = vpop.f32.mrb[57].mxu0  ;;  %v712_v25 = vpop.f32.mrb[57].mxu1 }
 0x160   :  { %777 = vst.msk [vmem:[%s1659_s3 + $0x1c8] sm:$0xff] %vm720_vm1, %v562_v24  ;;  %837 = vst.msk [vmem:[%s1659_s3 + $0x3a8] sm:$0xff] %vm720_vm1, %v712_v25  ;;  %v564_v26 = vpop.f32.mrb[58].mxu0  ;;  %v714_v27 = vpop.f32.mrb[58].mxu1 }
 0x161   :  { %778 = vst [vmem:[%s1659_s3 + $0x1d0] sm:$0xff] %v564_v26  ;;  %838 = vst [vmem:[%s1659_s3 + $0x3b0] sm:$0xff] %v714_v27  ;;  %v566_v28 = vpop.f32.mrb[59].mxu0  ;;  %v716_v29 = vpop.f32.mrb[59].mxu1 }
 0x162   :  { %779 = vst.msk [vmem:[%s1659_s3 + $0x1d8] sm:$0xff] %vm720_vm1, %v566_v28  ;;  %839 = vst.msk [vmem:[%s1659_s3 + $0x3b8] sm:$0xff] %vm720_vm1, %v716_v29 }

</bundles_post_ra>
